<compile_context>
chip_gen: v7x
topology: tpu7x:2x2x1
jax: 0.10.0
libtpu: 0.0.40
codegen_flags: <defaults>
</compile_context>

<pallas_src>
from functools import partial

import jax
import jax.numpy as jnp
from jax import lax
from jax.experimental import pallas as pl
from jax.experimental.pallas import tpu as pltpu


def _round_up(x, m):
    return ((x + m - 1) // m) * m


def _default_num_tiles():
    # v7x has 2 TensorCores per chip: give each its own batch tile. v5e/v6e: 1 tile.
    try:
        kind = jax.devices()[0].device_kind.lower()
    except Exception:
        return 1
    return 2 if ("v7" in kind or "tpu7" in kind) else 1


def pad_params(params):
    """One-time zero-pad of the hidden dims to sublane (8) multiples (30->32, 20->24).
    Zero rows/cols are inert through ReLU and the following contraction."""
    w1, b1, w2, b2, w3, b3 = params
    h1, h2 = w1.shape[0], w2.shape[0]
    h1p, h2p = _round_up(h1, 8), _round_up(h2, 8)
    w1 = jnp.pad(w1, ((0, h1p - h1), (0, 0)))
    b1 = jnp.pad(b1, ((0, h1p - h1), (0, 0)))
    w2 = jnp.pad(w2, ((0, h2p - h2), (0, h1p - h1)))
    b2 = jnp.pad(b2, ((0, h2p - h2), (0, 0)))
    w3 = jnp.pad(w3, ((0, 0), (0, h2p - h2)))
    return (w1, b1, w2, b2, w3, b3)


def mlp_kernel(xT_ref, w1_ref, b1_ref, w2_ref, b2_ref, w3_ref, b3_ref, oT_ref, *, chunk):
    # Resident weights/biases (tiny); compute in f32 regardless of I/O dtype (v5e-safe).
    w1 = w1_ref[...].astype(jnp.float32)
    b1 = b1_ref[...].astype(jnp.float32)
    w2 = w2_ref[...].astype(jnp.float32)
    b2 = b2_ref[...].astype(jnp.float32)
    w3 = w3_ref[...].astype(jnp.float32)
    b3 = b3_ref[...].astype(jnp.float32)

    n_chunks = xT_ref.shape[-1] // chunk

    def body(c, carry):
        off = pl.multiple_of(c * chunk, chunk)
        xT = xT_ref[:, pl.ds(off, chunk)].astype(jnp.float32)            # [nin, chunk]
        h1 = jnp.maximum(jnp.dot(w1, xT, preferred_element_type=jnp.float32) + b1, 0.0)
        h2 = jnp.maximum(jnp.dot(w2, h1, preferred_element_type=jnp.float32) + b2, 0.0)
        out = jnp.dot(w3, h2, preferred_element_type=jnp.float32) + b3
        oT_ref[:, pl.ds(off, chunk)] = out.astype(oT_ref.dtype)          # lane-dense store
        return carry

    lax.fori_loop(0, n_chunks, body, None, unroll=True)


def neural_network_forward_t(xT, params, *, num_tiles=None, max_chunk=512):
    """Core kernel on the transposed layout: xT [num_inputs, batch] -> [num_inputs, batch]."""
    num_inputs, batch = xT.shape
    w1, b1, w2, b2, w3, b3 = params

    if num_tiles is None:
        num_tiles = _default_num_tiles()
    num_tiles = max(1, min(int(num_tiles), pl.cdiv(batch, 128)))

    # One batch tile per (intended) core; Pallas masks the ragged last block.
    tb = _round_up(pl.cdiv(batch, num_tiles), 128)
    grid = (pl.cdiv(batch, tb),)
    # Inner chunk keeps intermediates in vregs; tb is a multiple of 128 so 128 always fits.
    chunk = next(c for c in (max_chunk, 512, 256, 128) if c <= tb and tb % c == 0)

    act_spec = pl.BlockSpec((num_inputs, tb), lambda i: (0, i))

    def resident(p):
        # Full-array block, constant index -> stays in VMEM across all grid steps.
        return pl.BlockSpec(p.shape, lambda i: (0, 0))

    return pl.pallas_call(
        partial(mlp_kernel, chunk=chunk),
        out_shape=jax.ShapeDtypeStruct((num_inputs, batch), xT.dtype),
        grid=grid,
        in_specs=[
            act_spec,
            resident(w1), resident(b1),
            resident(w2), resident(b2),
            resident(w3), resident(b3),
        ],
        out_specs=act_spec,
        compiler_params=pltpu.CompilerParams(
            dimension_semantics=("parallel",),   # v7x: shard the (<=2) batch tiles across TCs
        ),
    )(xT, w1, b1, w2, b2, w3, b3)


def neural_network_forward(x, params, *, num_tiles=None, io_dtype=None):
    """Module-semantics API: x [batch, num_inputs] -> logits [batch, num_inputs].

    io_dtype=jnp.bfloat16 halves HBM traffic for the streamed activations on v6e/v7x;
    compute stays f32 inside the kernel."""
    xT = x.T
    if io_dtype is not None and io_dtype != x.dtype:
        xT = xT.astype(io_dtype)
    outT = neural_network_forward_t(xT, params, num_tiles=num_tiles)
    return outT.T


def init_params(key, num_inputs):
    """Deterministic init mirroring the PyTorch layer shapes.
    PyTorch Linear(in, out): weight [out, in]; bias stored here as [out, 1]."""
    dims = [(num_inputs, 30), (30, 20), (20, num_inputs)]
    params = []
    for fan_in, fan_out in dims:
        kw, kb, key = jax.random.split(key, 3)
        bound = 1.0 / jnp.sqrt(fan_in)  # PyTorch default uniform bound
        w = jax.random.uniform(kw, (fan_out, fan_in), jnp.float32, -bound, bound)
        b = jax.random.uniform(kb, (fan_out, 1), jnp.float32, -bound, bound)
        params.extend([w, b])
    return tuple(params)


def reference_forward(x, params):
    w1, b1, w2, b2, w3, b3 = params
    h1 = jnp.maximum(x @ w1.T + b1[:, 0], 0.0)
    h2 = jnp.maximum(h1 @ w2.T + b2[:, 0], 0.0)
    return h2 @ w3.T + b3[:, 0]


if __name__ == "__main__":
    # num_outputs is unused by the module's forward (last layer maps back to num_inputs).
    batch, num_inputs, num_outputs = 1000, 16, 3

    key = jax.random.PRNGKey(0)
    kx, kp = jax.random.split(key)
    x = jax.random.normal(kx, (batch, num_inputs), jnp.float32)
    params = init_params(kp, num_inputs)
    padded = pad_params(params)  # one-time host-side layout prep (30->32, 20->24)

    ref = reference_forward(x, params)

    # Default config: single batch tile (two on v7x), f32 I/O, ragged last block masked.
    out = jax.block_until_ready(neural_network_forward(x, padded))
    assert out.shape == (batch, num_inputs)
    assert jnp.allclose(out, ref, atol=1e-4, rtol=1e-5), "f32 Pallas output mismatch vs reference"

    # Forced 2-tile config (exercises the multi-tile 'parallel' path on every generation).
    out2 = jax.block_until_ready(neural_network_forward(x, padded, num_tiles=2))
    assert jnp.allclose(out2, ref, atol=1e-4, rtol=1e-5), "2-tile Pallas output mismatch"

    # bf16 activation-I/O path (v6e/v7x HBM savings); accumulation stays f32 -> loose tol.
    out_bf16 = jax.block_until_ready(
        neural_network_forward(x, padded, io_dtype=jnp.bfloat16)).astype(jnp.float32)
    assert jnp.allclose(out_bf16, ref, atol=1e-1, rtol=5e-2), "bf16-I/O Pallas output mismatch"

    print("KERNEL_OK")
</pallas_src>

<mosaic_0001>
module attributes {stable_mosaic.version = 11 : i64} {
  func.func @mlp_kernel(%arg0: i32, %arg1: memref<16x1024xf32, #tpu.memory_space<vmem>>, %arg2: memref<32x16xf32, #tpu.memory_space<vmem>>, %arg3: memref<32x1xf32, #tpu.memory_space<vmem>>, %arg4: memref<24x32xf32, #tpu.memory_space<vmem>>, %arg5: memref<24x1xf32, #tpu.memory_space<vmem>>, %arg6: memref<16x24xf32, #tpu.memory_space<vmem>>, %arg7: memref<16x1xf32, #tpu.memory_space<vmem>>, %arg8: memref<16x1024xf32, #tpu.memory_space<vmem>>) attributes {dimension_semantics = [#tpu.dimension_semantics<parallel>], iteration_bounds = array<i64: 1>, scalar_prefetch = 0 : i64, scratch_operands = 0 : i64, tpu.core_type = #tpu.core_type<tc>, window_params = [{transform_indices = @transform_0, window_bounds = array<i64: 16, 1024>}, {pipeline_mode = #tpu.pipeline_mode<synchronous>, transform_indices = @transform_1, window_bounds = array<i64: 32, 16>}, {pipeline_mode = #tpu.pipeline_mode<synchronous>, transform_indices = @transform_2, window_bounds = array<i64: 32, 1>}, {pipeline_mode = #tpu.pipeline_mode<synchronous>, transform_indices = @transform_3, window_bounds = array<i64: 24, 32>}, {pipeline_mode = #tpu.pipeline_mode<synchronous>, transform_indices = @transform_4, window_bounds = array<i64: 24, 1>}, {pipeline_mode = #tpu.pipeline_mode<synchronous>, transform_indices = @transform_5, window_bounds = array<i64: 16, 24>}, {pipeline_mode = #tpu.pipeline_mode<synchronous>, transform_indices = @transform_6, window_bounds = array<i64: 16, 1>}, {transform_indices = @transform_7, window_bounds = array<i64: 16, 1024>}]} {
    %c0 = arith.constant 0 : index
    %c0_0 = arith.constant 0 : index
    %0 = vector.load %arg2[%c0, %c0_0] : memref<32x16xf32, #tpu.memory_space<vmem>>, vector<32x16xf32>
    %c0_1 = arith.constant 0 : index
    %c0_2 = arith.constant 0 : index
    %1 = vector.load %arg3[%c0_1, %c0_2] : memref<32x1xf32, #tpu.memory_space<vmem>>, vector<32x1xf32>
    %c0_3 = arith.constant 0 : index
    %c0_4 = arith.constant 0 : index
    %2 = vector.load %arg4[%c0_3, %c0_4] : memref<24x32xf32, #tpu.memory_space<vmem>>, vector<24x32xf32>
    %c0_5 = arith.constant 0 : index
    %c0_6 = arith.constant 0 : index
    %3 = vector.load %arg5[%c0_5, %c0_6] : memref<24x1xf32, #tpu.memory_space<vmem>>, vector<24x1xf32>
    %c0_7 = arith.constant 0 : index
    %c0_8 = arith.constant 0 : index
    %4 = vector.load %arg6[%c0_7, %c0_8] : memref<16x24xf32, #tpu.memory_space<vmem>>, vector<16x24xf32>
    %c0_9 = arith.constant 0 : index
    %c0_10 = arith.constant 0 : index
    %5 = vector.load %arg7[%c0_9, %c0_10] : memref<16x1xf32, #tpu.memory_space<vmem>>, vector<16x1xf32>
    %c0_i32 = arith.constant 0 : i32
    %c512_i32 = arith.constant 512 : i32
    %6 = arith.muli %c0_i32, %c512_i32 : i32
    %7 = tpu.assume_multiple %6, 512 : i32
    %c0_11 = arith.constant 0 : index
    %8 = arith.index_cast %7 : i32 to index
    %9 = vector.load %arg1[%c0_11, %8] : memref<16x1024xf32, #tpu.memory_space<vmem>>, vector<16x512xf32>
    %cst = arith.constant dense<0.000000e+00> : vector<32x512xf32>
    %10 = tpu.matmul %0, %9, %cst {dimension_numbers = #tpu.dot_dimension_numbers<[1], [0], [0], [1], [0, 0, 1, 1], [], []>} : vector<32x16xf32>, vector<16x512xf32>, vector<32x512xf32> -> vector<32x512xf32>
    %11 = vector.broadcast %1 : vector<32x1xf32> to vector<32x512xf32>
    %12 = arith.addf %10, %11 : vector<32x512xf32>
    %cst_12 = arith.constant 0.000000e+00 : f32
    %13 = vector.broadcast %cst_12 : f32 to vector<32x512xf32>
    %14 = arith.maximumf %12, %13 : vector<32x512xf32>
    %cst_13 = arith.constant dense<0.000000e+00> : vector<24x512xf32>
    %15 = tpu.matmul %2, %14, %cst_13 {dimension_numbers = #tpu.dot_dimension_numbers<[1], [0], [0], [1], [0, 0, 1, 1], [], []>} : vector<24x32xf32>, vector<32x512xf32>, vector<24x512xf32> -> vector<24x512xf32>
    %16 = vector.broadcast %3 : vector<24x1xf32> to vector<24x512xf32>
    %17 = arith.addf %15, %16 : vector<24x512xf32>
    %cst_14 = arith.constant 0.000000e+00 : f32
    %18 = vector.broadcast %cst_14 : f32 to vector<24x512xf32>
    %19 = arith.maximumf %17, %18 : vector<24x512xf32>
    %cst_15 = arith.constant dense<0.000000e+00> : vector<16x512xf32>
    %20 = tpu.matmul %4, %19, %cst_15 {dimension_numbers = #tpu.dot_dimension_numbers<[1], [0], [0], [1], [0, 0, 1, 1], [], []>} : vector<16x24xf32>, vector<24x512xf32>, vector<16x512xf32> -> vector<16x512xf32>
    %21 = vector.broadcast %5 : vector<16x1xf32> to vector<16x512xf32>
    %22 = arith.addf %20, %21 : vector<16x512xf32>
    %c0_16 = arith.constant 0 : index
    %23 = arith.index_cast %7 : i32 to index
    %24 = vector.load %arg8[%c0_16, %23] : memref<16x1024xf32, #tpu.memory_space<vmem>>, vector<16x512xf32>
    tpu.vector_store %arg8[%c0_16, %23], %22 {strides = array<i32>} : memref<16x1024xf32, #tpu.memory_space<vmem>>, vector<16x512xf32>,
    %c1_i32 = arith.constant 1 : i32
    %c512_i32_17 = arith.constant 512 : i32
    %25 = arith.muli %c1_i32, %c512_i32_17 : i32
    %26 = tpu.assume_multiple %25, 512 : i32
    %c0_18 = arith.constant 0 : index
    %27 = arith.index_cast %26 : i32 to index
    %28 = vector.load %arg1[%c0_18, %27] : memref<16x1024xf32, #tpu.memory_space<vmem>>, vector<16x512xf32>
    %cst_19 = arith.constant dense<0.000000e+00> : vector<32x512xf32>
    %29 = tpu.matmul %0, %28, %cst_19 {dimension_numbers = #tpu.dot_dimension_numbers<[1], [0], [0], [1], [0, 0, 1, 1], [], []>} : vector<32x16xf32>, vector<16x512xf32>, vector<32x512xf32> -> vector<32x512xf32>
    %30 = vector.broadcast %1 : vector<32x1xf32> to vector<32x512xf32>
    %31 = arith.addf %29, %30 : vector<32x512xf32>
    %cst_20 = arith.constant 0.000000e+00 : f32
    %32 = vector.broadcast %cst_20 : f32 to vector<32x512xf32>
    %33 = arith.maximumf %31, %32 : vector<32x512xf32>
    %cst_21 = arith.constant dense<0.000000e+00> : vector<24x512xf32>
    %34 = tpu.matmul %2, %33, %cst_21 {dimension_numbers = #tpu.dot_dimension_numbers<[1], [0], [0], [1], [0, 0, 1, 1], [], []>} : vector<24x32xf32>, vector<32x512xf32>, vector<24x512xf32> -> vector<24x512xf32>
    %35 = vector.broadcast %3 : vector<24x1xf32> to vector<24x512xf32>
    %36 = arith.addf %34, %35 : vector<24x512xf32>
    %cst_22 = arith.constant 0.000000e+00 : f32
    %37 = vector.broadcast %cst_22 : f32 to vector<24x512xf32>
    %38 = arith.maximumf %36, %37 : vector<24x512xf32>
    %cst_23 = arith.constant dense<0.000000e+00> : vector<16x512xf32>
    %39 = tpu.matmul %4, %38, %cst_23 {dimension_numbers = #tpu.dot_dimension_numbers<[1], [0], [0], [1], [0, 0, 1, 1], [], []>} : vector<16x24xf32>, vector<24x512xf32>, vector<16x512xf32> -> vector<16x512xf32>
    %40 = vector.broadcast %5 : vector<16x1xf32> to vector<16x512xf32>
    %41 = arith.addf %39, %40 : vector<16x512xf32>
    %c0_24 = arith.constant 0 : index
    %42 = arith.index_cast %26 : i32 to index
    %43 = vector.load %arg8[%c0_24, %42] : memref<16x1024xf32, #tpu.memory_space<vmem>>, vector<16x512xf32>
    tpu.vector_store %arg8[%c0_24, %42], %41 {strides = array<i32>} : memref<16x1024xf32, #tpu.memory_space<vmem>>, vector<16x512xf32>,
    %c2_i32 = arith.constant 2 : i32
    return
  }
  func.func @transform_0(%arg0: i32) -> (i32, i32) {
    %c0_i32 = arith.constant 0 : i32
    %c0_i32_0 = arith.constant 0 : i32
    return %c0_i32, %arg0 : i32, i32
  }
  func.func @transform_1(%arg0: i32) -> (i32, i32) {
    %c0_i32 = arith.constant 0 : i32
    %c0_i32_0 = arith.constant 0 : i32
    %c0_i32_1 = arith.constant 0 : i32
    return %c0_i32, %c0_i32_0 : i32, i32
  }
  func.func @transform_2(%arg0: i32) -> (i32, i32) {
    %c0_i32 = arith.constant 0 : i32
    %c0_i32_0 = arith.constant 0 : i32
    %c0_i32_1 = arith.constant 0 : i32
    return %c0_i32, %c0_i32_0 : i32, i32
  }
  func.func @transform_3(%arg0: i32) -> (i32, i32) {
    %c0_i32 = arith.constant 0 : i32
    %c0_i32_0 = arith.constant 0 : i32
    %c0_i32_1 = arith.constant 0 : i32
    return %c0_i32, %c0_i32_0 : i32, i32
  }
  func.func @transform_4(%arg0: i32) -> (i32, i32) {
    %c0_i32 = arith.constant 0 : i32
    %c0_i32_0 = arith.constant 0 : i32
    %c0_i32_1 = arith.constant 0 : i32
    return %c0_i32, %c0_i32_0 : i32, i32
  }
  func.func @transform_5(%arg0: i32) -> (i32, i32) {
    %c0_i32 = arith.constant 0 : i32
    %c0_i32_0 = arith.constant 0 : i32
    %c0_i32_1 = arith.constant 0 : i32
    return %c0_i32, %c0_i32_0 : i32, i32
  }
  func.func @transform_6(%arg0: i32) -> (i32, i32) {
    %c0_i32 = arith.constant 0 : i32
    %c0_i32_0 = arith.constant 0 : i32
    %c0_i32_1 = arith.constant 0 : i32
    return %c0_i32, %c0_i32_0 : i32, i32
  }
  func.func @transform_7(%arg0: i32) -> (i32, i32) {
    %c0_i32 = arith.constant 0 : i32
    %c0_i32_0 = arith.constant 0 : i32
    return %c0_i32, %arg0 : i32, i32
  }
}

</mosaic_0001>

<bundles_post_ra>
// kernel: tpu_custom_call.1
= control target key start
LH: loop header
LB: loop body
LE: loop exit
PB: predicated region body
PF: predicated region fallthrough
CT: control target
= control target key end

     0   :  { %12 = vsyncpa [#allocation3], 0  ;;  %s1739_s0 = inlined_call_operand.hbm [shape: f32[16,1000], index: 0, kind: input, shape index: {}]   ;;  %s1740_s1 = inlined_call_operand.vmem [shape: f32[32,16], index: 1, kind: input, shape index: {}]   ;;  %s1741_s2 = inlined_call_operand.vmem [shape: f32[32,1], index: 2, kind: input, shape index: {}]   ;;  %s1742_s3 = inlined_call_operand.vmem [shape: f32[24,32], index: 3, kind: input, shape index: {}]   ;;  %s1743_s4 = inlined_call_operand.vmem [shape: f32[24,1], index: 4, kind: input, shape index: {}]   ;;  %s1744_s5 = inlined_call_operand.vmem [shape: f32[16,24], index: 5, kind: input, shape index: {}]   ;;  %s1745_s6 = inlined_call_operand.vmem [shape: f32[16,1], index: 6, kind: input, shape index: {}]   ;;  %s1746_s7 = inlined_call_operand.hbm [shape: f32[16,1000], index: 7, kind: output, shape index: {}]  }
   0x1   :  { %13 = vsyncpa [#allocation4], 0  ;;  %s1393_s24 = smov [#allocation2]   ;;  %s1345_s28 = scalar_lea.hbm %s1739_s0, 2048 }
   0x2   :  { %s19_s25 = sshll.u32 %s1393_s24, 4  ;;  %p1346_p0 = scmp.ne.s32.totalorder %s1739_s0, %s1345_s28  ;;  %s20_s25 = int_to_ptr.vmem [resolvable:$true] %s19_s25 }
   0x3   :  { %p1349_p1 = scmp.lt.u32.totalorder %s1345_s28, %s1739_s0 }
   0x5   :  { %p1351_p2 = pnand %p1349_p1, %p1346_p0 }
   0x7   :  { %1354 = shalt.err (!%p1351_p2)
}
   0x8   :  { %s1355_s10 = scalar_lea.vmem %s20_s25, 2048  ;;  %p1360_p4 = scmp.lt.s32.totalorder %s20_s25, %s20_s25 }
   0x9   :  { %p1356_p3 = scmp.ne.s32.totalorder %s20_s25, %s1355_s10  ;;  %p1361_p5 = scmp.lt.s32.totalorder %s1355_s10, %s1355_s10 }
   0xb   :  { %p1362_p6 = por %p1361_p5, %p1360_p4 }
   0xd   :  { %p1363_p7 = pnand %p1362_p6, %p1356_p3 }
   0xf   :  { %1366 = shalt.err (!%p1363_p7)
}
  0x10   :  { %s1394_s11 = smov 1024   ;;  %s1395_s12 = smov 64  }
  0x11   :  { %25 = dma.hbm_to_vmem [thread:$0]  %s1739_s0, 2048, %s20_s25, [#allocation3], %s1394_s11, %s1394_s11, %s1395_s12  }
  0x12   :  { %1389 = dma.done.wait [#allocation3], 2048  }
  0x13   :  { %1390 = vsyncadd [#allocation3], 4294965248  ;;  %v1396_v0 = vmov 0.0   ;;  %v1397_v1 = vmov 0   ;;  %v60_v2 = vld [vmem:[#allocation2 + $0x8] sm:$0xff]  ;;  %v62_v4 = vld [vmem:[#allocation2 + $0x18] sm:$0xff] }
  0x14   :  { %164 = vmatprep.mubr.f32.mxu0 %v1396_v0  ;;  %253 = vmatprep.mubr.f32.mxu1 %v1396_v0  ;;  %v64_v3 = vld [vmem:[#allocation2 + $0x48] sm:$0xff]  ;;  %v66_v6 = vld [vmem:[#allocation2 + $0x58] sm:$0xff]  ;;  %v59_v7 = vld [vmem:[#allocation2] sm:$0xff]  ;;  %vm87_vm0 = vcmask 130048   ;;  %vm309_vm1 = vcmask 261120   ;;  %vm507_vm2 = vcmask 195584  }
  0x15   :  { %1343 = vset.pattern.permute.xlu0 %v1397_v1  ;;  %1344 = vset.pattern.permute.xlu1 %v1397_v1  ;;  %v1273_v5 = vpack.c.bf16 %v64_v3, %v60_v2  ;;  %v63_v8 = vld [vmem:[#allocation2 + $0x40] sm:$0xff]  ;;  %v1277_v9 = vpack.c.bf16 %v66_v6, %v62_v4  ;;  %v61_v11 = vld [vmem:[#allocation2 + $0x10] sm:$0xff]  ;;  %v46_v17 = vld [vmem:[%s1741_s2 + $0x8] sm:$0xff] }
  0x16   :  { %v1275_v10 = vpack.c.bf16 %v63_v8, %v59_v7  ;;  %v65_v12 = vld [vmem:[#allocation2 + $0x50] sm:$0xff]  ;;  %v1459_v14 = vld [vmem:[%s1740_s1] sm:$0xff]  ;;  %v48_v18 = vld [vmem:[%s1741_s2 + $0x18] sm:$0xff] }
  0x17   :  { %1274 = vmatprep.subr.bf16.mxu0 %v1273_v5  ;;  %v1279_v13 = vpack.c.bf16 %v65_v12, %v61_v11  ;;  %1278 = vmatprep.subr.bf16.mxu1 %v1277_v9  ;;  %v45_v15 = vld [vmem:[%s1741_s2] sm:$0xff]  ;;  %v47_v16 = vld [vmem:[%s1741_s2 + $0x10] sm:$0xff]  ;;  %v1481_v19 = vld [vmem:[%s1740_s1 + $0x8] sm:$0xff] }
  0x18   :  { %1276 = vmatpush1.bf16.msra.mxu0 %v1275_v10  ;;  %69 = vperm.xlu0 %1343, %v45_v15   ;;  %v52_v20 = vld [vmem:[%s1743_s4] sm:$0xff]  ;;  %v53_v21 = vld [vmem:[%s1743_s4 + $0x8] sm:$0xff]  ;;  %v1498_v22 = vld [vmem:[%s1740_s1 + $0x10] sm:$0xff] }
  0x19   :  { %1280 = vmatpush1.bf16.msra.mxu1 %v1279_v13  ;;  %79 = vperm.xlu1 %1344, %v47_v16   ;;  %v54_v23 = vld [vmem:[%s1743_s4 + $0x10] sm:$0xff]  ;;  %v57_v24 = vld [vmem:[%s1745_s6] sm:$0xff]  ;;  %v1515_v25 = vld [vmem:[%s1740_s1 + $0x18] sm:$0xff] }
  0x1a   :  { %v58_v26 = vld [vmem:[%s1745_s6 + $0x8] sm:$0xff] }
  0x1b   :  { %1237 = vmatmul.mubr.msk.f32.vlgmr.msra.gmra.mrb[0].mxu0 %vm87_vm0, %v1459_v14 }
  0x1c   :  { %1241 = vmatmul.mubr.msk.f32.vlgmr.msra.gmra.mrb[0].mxu1 %vm87_vm0, %v1459_v14  ;;  %170 = vmatprep.mubr.f32.mxu0 %v1396_v0 }
  0x1d   :  { %259 = vmatprep.mubr.f32.mxu1 %v1396_v0  ;;  %74 = vperm.xlu0 %1343, %v46_v17  }
  0x1e   :  { %84 = vperm.xlu1 %1344, %v48_v18  }
  0x1f   :  { %1238 = vmatmul.mubr.msk.f32.gmra.mrb[2].mxu0 %vm87_vm0, %v1481_v19 }
  0x20   :  { %1242 = vmatmul.mubr.msk.f32.gmra.mrb[2].mxu1 %vm87_vm0, %v1481_v19  ;;  %176 = vmatprep.mubr.f32.mxu0 %v1396_v0 }
  0x21   :  { %265 = vmatprep.mubr.f32.mxu1 %v1396_v0  ;;  %296 = vperm.xlu0 %1343, %v52_v20  }
  0x22   :  { %301 = vperm.xlu1 %1344, %v53_v21  }
  0x23   :  { %1239 = vmatmul.mubr.msk.f32.gmra.mrb[4].mxu0 %vm87_vm0, %v1498_v22 }
  0x24   :  { %1243 = vmatmul.mubr.msk.f32.gmra.mrb[4].mxu1 %vm87_vm0, %v1498_v22  ;;  %182 = vmatprep.mubr.f32.mxu0 %v1396_v0 }
  0x25   :  { %271 = vmatprep.mubr.f32.mxu1 %v1396_v0  ;;  %306 = vperm.xlu0 %1343, %v54_v23  }
  0x26   :  { %499 = vperm.xlu1 %1344, %v57_v24  }
  0x27   :  { %1240 = vmatmul.mubr.msk.f32.gmra.mrb[6].mxu0 %vm87_vm0, %v1515_v25 }
  0x28   :  { %1244 = vmatmul.mubr.msk.f32.gmra.mrb[6].mxu1 %vm87_vm0, %v1515_v25  ;;  %383 = vmatprep.mubr.f32.mxu0 %v1396_v0 }
  0x29   :  { %504 = vperm.xlu0 %1343, %v58_v26   ;;  %466 = vmatprep.mubr.f32.mxu1 %v1396_v0 }
  0x97   :  { %v1527_v27 = vpop.permute.xlu0 %69 }
  0x98   :  { %v1536_v41 = vpop.permute.xlu1 %79 }
  0x9c   :  { %v1530_v33 = vpop.permute.xlu0 %74 }
  0x9d   :  { %v1542_v63 = vpop.permute.xlu1 %84 }
  0xee   :  { %v166_v28 = vpop.f32.mrb[0].mxu0 }
  0xef   :  { %v255_v29 = vpop.f32.mrb[0].mxu1  ;;  %v168_v30 = vpop.f32.mrb[1].mxu0  ;;  %v167_v32 = vadd.f32 %v166_v28, %v1527_v27 }
  0xf0   :  { %v257_v31 = vpop.f32.mrb[1].mxu1  ;;  %v256_v34 = vadd.f32 %v255_v29, %v1527_v27  ;;  %v169_v35 = vadd.f32 %v168_v30, %v1527_v27  ;;  %v1554_v29 = vld [vmem:[%s1742_s3] sm:$0xff]  ;;  %v1564_v30 = vld [vmem:[%s1742_s3 + $0x8] sm:$0xff] }
  0xf1   :  { %v258_v37 = vadd.f32 %v257_v31, %v1527_v27  ;;  %v278_v45 = vmax.f32 %v167_v32, 0.0  ;;  %v1575_v31 = vld [vmem:[%s1742_s3 + $0x10] sm:$0xff] }
  0xf2   :  { %v172_v36 = vpop.f32.mrb[2].mxu0  ;;  %v280_v48 = vmax.f32 %v256_v34, 0.0  ;;  %v279_v49 = vmax.f32 %v169_v35, 0.0 }
  0xf3   :  { %v173_v38 = vadd.f32 %v172_v36, %v1530_v33  ;;  %v261_v39 = vpop.f32.mrb[2].mxu1  ;;  %v174_v40 = vpop.f32.mrb[3].mxu0  ;;  %v281_v53 = vmax.f32 %v258_v37, 0.0 }
  0xf4   :  { %v262_v42 = vadd.f32 %v261_v39, %v1530_v33  ;;  %v175_v43 = vadd.f32 %v174_v40, %v1530_v33  ;;  %v263_v44 = vpop.f32.mrb[3].mxu1  ;;  %v1584_v36 = vpop.permute.xlu0 %296 }
  0xf5   :  { %v282_v46 = vmax.f32 %v173_v38, 0.0  ;;  %v264_v47 = vadd.f32 %v263_v44, %v1530_v33  ;;  %v1587_v39 = vpop.permute.xlu1 %301 }
  0xf6   :  { %v284_v50 = vmax.f32 %v262_v42, 0.0  ;;  %v283_v51 = vmax.f32 %v175_v43, 0.0  ;;  %v178_v52 = vpop.f32.mrb[4].mxu0 }
  0xf7   :  { %v1283_v54 = vpack.c.bf16 %v282_v46, %v278_v45  ;;  %v285_v55 = vmax.f32 %v264_v47, 0.0  ;;  %v267_v56 = vpop.f32.mrb[4].mxu1  ;;  %v180_v57 = vpop.f32.mrb[5].mxu0  ;;  %v179_v62 = vadd.f32 %v178_v52, %v1536_v41 }
  0xf8   :  { %v1291_v58 = vpack.c.bf16 %v284_v50, %v280_v48  ;;  %v1281_v59 = vpack.c.bf16 %v283_v51, %v279_v49  ;;  %v269_v60 = vpop.f32.mrb[5].mxu1  ;;  %v268_v1 = vadd.f32 %v267_v56, %v1536_v41  ;;  %v181_v2 = vadd.f32 %v180_v57, %v1536_v41 }
  0xf9   :  { %v1289_v61 = vpack.c.bf16 %v285_v55, %v281_v53  ;;  %v270_v4 = vadd.f32 %v269_v60, %v1536_v41  ;;  %v286_v11 = vmax.f32 %v179_v62, 0.0 }
  0xfa   :  { %v184_v3 = vpop.f32.mrb[6].mxu0  ;;  %1282 = vmatprep.subr.bf16.mxu0 %v1281_v59  ;;  %v288_v15 = vmax.f32 %v268_v1, 0.0  ;;  %v287_v16 = vmax.f32 %v181_v2, 0.0 }
  0xfb   :  { %v185_v5 = vadd.f32 %v184_v3, %v1542_v63  ;;  %v273_v6 = vpop.f32.mrb[6].mxu1  ;;  %1290 = vmatprep.subr.bf16.mxu1 %v1289_v61  ;;  %v186_v7 = vpop.f32.mrb[7].mxu0  ;;  %1284 = vmatpush1.bf16.msra.mxu0 %v1283_v54  ;;  %v289_v20 = vmax.f32 %v270_v4, 0.0 }
  0xfc   :  { %v274_v8 = vadd.f32 %v273_v6, %v1542_v63  ;;  %v187_v9 = vadd.f32 %v186_v7, %v1542_v63  ;;  %v275_v10 = vpop.f32.mrb[7].mxu1  ;;  %1292 = vmatpush1.bf16.msra.mxu1 %v1291_v58  ;;  %v1596_v54 = vpop.permute.xlu0 %306 }
  0xfd   :  { %v290_v12 = vmax.f32 %v185_v5, 0.0  ;;  %v276_v13 = vadd.f32 %v275_v10, %v1542_v63 }
  0xfe   :  { %v292_v17 = vmax.f32 %v274_v8, 0.0  ;;  %v291_v18 = vmax.f32 %v187_v9, 0.0 }
  0xff   :  { %v1287_v21 = vpack.c.bf16 %v290_v12, %v286_v11  ;;  %v293_v23 = vmax.f32 %v276_v13, 0.0  ;;  %v678_v13 = vld [vmem:[#allocation2 + $0x28] sm:$0xff] }
 0x100   :  { %v1295_v24 = vpack.c.bf16 %v292_v17, %v288_v15  ;;  %v1285_v26 = vpack.c.bf16 %v291_v18, %v287_v16  ;;  %v682_v15 = vld [vmem:[#allocation2 + $0x68] sm:$0xff]  ;;  %v680_v16 = vld [vmem:[#allocation2 + $0x38] sm:$0xff]  ;;  %v677_v18 = vld [vmem:[#allocation2 + $0x20] sm:$0xff] }
 0x101   :  { %v1293_v28 = vpack.c.bf16 %v293_v23, %v289_v20  ;;  %v684_v17 = vld [vmem:[#allocation2 + $0x78] sm:$0xff]  ;;  %v681_v20 = vld [vmem:[#allocation2 + $0x60] sm:$0xff] }
 0x102   :  { %1286 = vmatprep.subr.bf16.mxu0 %v1285_v26  ;;  %v1605_v23 = vld [vmem:[%s1744_s5] sm:$0xff]  ;;  %v683_v26 = vld [vmem:[#allocation2 + $0x70] sm:$0xff] }
 0x103   :  { %1294 = vmatprep.subr.bf16.mxu1 %v1293_v28  ;;  %1288 = vmatpush1.bf16.msra.mxu0 %v1287_v21 }
 0x104   :  { %1296 = vmatpush1.bf16.msra.mxu1 %v1295_v24  ;;  %v679_v24 = vld [vmem:[#allocation2 + $0x30] sm:$0xff] }
 0x106   :  { %1245 = vmatmul.mubr.msk.f32.vlgmr.msra.gmra.mrb[8].mxu0 %vm309_vm1, %v1554_v29 }
 0x107   :  { %1248 = vmatmul.mubr.msk.f32.vlgmr.msra.gmra.mrb[8].mxu1 %vm309_vm1, %v1554_v29  ;;  %389 = vmatprep.mubr.f32.mxu0 %v1396_v0 }
 0x108   :  { %472 = vmatprep.mubr.f32.mxu1 %v1396_v0 }
 0x10a   :  { %1246 = vmatmul.mubr.msk.f32.gmra.mrb[10].mxu0 %vm309_vm1, %v1564_v30 }
 0x10b   :  { %1249 = vmatmul.mubr.msk.f32.gmra.mrb[10].mxu1 %vm309_vm1, %v1564_v30  ;;  %395 = vmatprep.mubr.f32.mxu0 %v1396_v0 }
 0x10c   :  { %478 = vmatprep.mubr.f32.mxu1 %v1396_v0 }
 0x10e   :  { %1247 = vmatmul.mubr.msk.f32.gmra.mrb[12].mxu0 %vm309_vm1, %v1575_v31 }
 0x10f   :  { %1250 = vmatmul.mubr.msk.f32.gmra.mrb[12].mxu1 %vm309_vm1, %v1575_v31  ;;  %578 = vmatprep.mubr.f32.mxu0 %v1396_v0 }
 0x110   :  { %655 = vmatprep.mubr.f32.mxu1 %v1396_v0 }
 0x1d9   :  { %v385_v32 = vpop.f32.mrb[8].mxu0 }
 0x1da   :  { %v468_v34 = vpop.f32.mrb[8].mxu1  ;;  %v387_v35 = vpop.f32.mrb[9].mxu0  ;;  %v386_v38 = vadd.f32 %v385_v32, %v1584_v36  ;;  %v1305_v32 = vpack.c.bf16 %v682_v15, %v678_v13 }
 0x1db   :  { %v470_v37 = vpop.f32.mrb[9].mxu1  ;;  %v469_v40 = vadd.f32 %v468_v34, %v1584_v36  ;;  %v388_v42 = vadd.f32 %v387_v35, %v1584_v36  ;;  %v1309_v34 = vpack.c.bf16 %v684_v17, %v680_v16  ;;  %v1307_v35 = vpack.c.bf16 %v681_v20, %v677_v18 }
 0x1dc   :  { %v471_v44 = vadd.f32 %v470_v37, %v1584_v36  ;;  %v485_v51 = vmax.f32 %v386_v38, 0.0  ;;  %v1311_v37 = vpack.c.bf16 %v683_v26, %v679_v24  ;;  %v1615_v38 = vld [vmem:[%s1744_s5 + $0x8] sm:$0xff]  ;;  %s1398_s5 = smov [#allocation5]  }
 0x1dd   :  { %v391_v43 = vpop.f32.mrb[10].mxu0  ;;  %v487_v55 = vmax.f32 %v469_v40, 0.0  ;;  %v486_v56 = vmax.f32 %v388_v42, 0.0  ;;  %s1225_s23 = sshll.u32 %s1398_s5, 4  ;;  %s1226_s23 = int_to_ptr.vmem [resolvable:$true] %s1225_s23 }
 0x1de   :  { %v392_v45 = vadd.f32 %v391_v43, %v1587_v39  ;;  %v474_v46 = vpop.f32.mrb[10].mxu1  ;;  %v393_v47 = vpop.f32.mrb[11].mxu0  ;;  %v488_v60 = vmax.f32 %v471_v44, 0.0  ;;  %s1367_s24 = scalar_lea.vmem %s1226_s23, 2048  ;;  %p1372_p9 = scmp.lt.s32.totalorder %s1226_s23, %s1226_s23 }
 0x1df   :  { %v475_v48 = vadd.f32 %v474_v46, %v1587_v39  ;;  %v394_v49 = vadd.f32 %v393_v47, %v1587_v39  ;;  %v476_v50 = vpop.f32.mrb[11].mxu1  ;;  %p1368_p8 = scmp.ne.s32.totalorder %s1226_s23, %s1367_s24  ;;  %p1373_p10 = scmp.lt.s32.totalorder %s1367_s24, %s1367_s24 }
 0x1e0   :  { %v489_v52 = vmax.f32 %v392_v45, 0.0  ;;  %v477_v53 = vadd.f32 %v476_v50, %v1587_v39 }
 0x1e1   :  { %v491_v57 = vmax.f32 %v475_v48, 0.0  ;;  %v490_v58 = vmax.f32 %v394_v49, 0.0  ;;  %v397_v59 = vpop.f32.mrb[12].mxu0  ;;  %p1374_p11 = por %p1373_p10, %p1372_p9 }
 0x1e2   :  { %v1299_v61 = vpack.c.bf16 %v489_v52, %v485_v51  ;;  %v492_v62 = vmax.f32 %v477_v53, 0.0  ;;  %v480_v1 = vpop.f32.mrb[12].mxu1  ;;  %v399_v2 = vpop.f32.mrb[13].mxu0  ;;  %v398_v8 = vadd.f32 %v397_v59, %v1596_v54 }
 0x1e3   :  { %v1303_v3 = vpack.c.bf16 %v491_v57, %v487_v55  ;;  %v1297_v4 = vpack.c.bf16 %v490_v58, %v486_v56  ;;  %v400_v5 = vadd.f32 %v399_v2, %v1596_v54  ;;  %v482_v6 = vpop.f32.mrb[13].mxu1  ;;  %v481_v10 = vadd.f32 %v480_v1, %v1596_v54  ;;  %p1375_p12 = pnand %p1374_p11, %p1368_p8 }
 0x1e4   :  { %v1301_v7 = vpack.c.bf16 %v492_v62, %v488_v60  ;;  %v483_v9 = vadd.f32 %v482_v6, %v1596_v54  ;;  %v493_v21 = vmax.f32 %v398_v8, 0.0 }
 0x1e5   :  { %v494_v11 = vmax.f32 %v400_v5, 0.0  ;;  %1298 = vmatprep.subr.bf16.mxu0 %v1297_v4  ;;  %v495_v28 = vmax.f32 %v481_v10, 0.0 }
 0x1e6   :  { %v496_v12 = vmax.f32 %v483_v9, 0.0  ;;  %1302 = vmatprep.subr.bf16.mxu1 %v1301_v7  ;;  %1300 = vmatpush1.bf16.msra.mxu0 %v1299_v61 }
 0x1e7   :  { %1304 = vmatpush1.bf16.msra.mxu1 %v1303_v3  ;;  %518 = vmatprep.subr.mxu0 %v494_v11 }
 0x1e8   :  { %595 = vmatprep.subr.mxu1 %v496_v12 }
 0x1ea   :  { %519 = vmatpush1.msra.mxu0 %v493_v21 }
 0x1eb   :  { %596 = vmatpush1.msra.mxu1 %v495_v28  ;;  %1251 = vmatmul.mubr.msk.f32.vlgmr.msra.gmra.mrb[14].mxu0 %vm507_vm2, %v1605_v23 }
 0x1ec   :  { %1253 = vmatmul.mubr.msk.f32.vlgmr.msra.gmra.mrb[14].mxu1 %vm507_vm2, %v1605_v23  ;;  %584 = vmatprep.mubr.f32.mxu0 %v1396_v0 }
 0x1ed   :  { %661 = vmatprep.mubr.f32.mxu1 %v1396_v0  ;;  %1306 = vmatprep.subr.bf16.mxu0 %v1305_v32 }
 0x1ee   :  { %1310 = vmatprep.subr.bf16.mxu1 %v1309_v34  ;;  %1308 = vmatpush1.bf16.msra.mxu0 %v1307_v35 }
 0x1ef   :  { %1252 = vmatmul.mubr.msk.f32.gmra.mrb[16].mxu0 %vm507_vm2, %v1615_v38  ;;  %1312 = vmatpush1.bf16.msra.mxu1 %v1311_v37 }
 0x1f0   :  { %1254 = vmatmul.mubr.msk.f32.gmra.mrb[16].mxu1 %vm507_vm2, %v1615_v38  ;;  %749 = vmatprep.mubr.f32.mxu0 %v1396_v0 }
 0x1f1   :  { %838 = vmatprep.mubr.f32.mxu1 %v1396_v0 }
 0x1f3   :  { %1255 = vmatmul.mubr.msk.f32.vlgmr.msra.gmra.mrb[18].mxu0 %vm87_vm0, %v1459_v14 }
 0x1f4   :  { %1259 = vmatmul.mubr.msk.f32.vlgmr.msra.gmra.mrb[18].mxu1 %vm87_vm0, %v1459_v14  ;;  %755 = vmatprep.mubr.f32.mxu0 %v1396_v0  ;;  %v1648_v14 = vpop.permute.xlu1 %499 }
 0x1f5   :  { %844 = vmatprep.mubr.f32.mxu1 %v1396_v0 }
 0x1f7   :  { %1256 = vmatmul.mubr.msk.f32.gmra.mrb[20].mxu0 %vm87_vm0, %v1481_v19 }
 0x1f8   :  { %1260 = vmatmul.mubr.msk.f32.gmra.mrb[20].mxu1 %vm87_vm0, %v1481_v19  ;;  %761 = vmatprep.mubr.f32.mxu0 %v1396_v0 }
 0x1f9   :  { %850 = vmatprep.mubr.f32.mxu1 %v1396_v0 }
 0x1fb   :  { %1257 = vmatmul.mubr.msk.f32.gmra.mrb[22].mxu0 %vm87_vm0, %v1498_v22 }
 0x1fc   :  { %1261 = vmatmul.mubr.msk.f32.gmra.mrb[22].mxu1 %vm87_vm0, %v1498_v22  ;;  %767 = vmatprep.mubr.f32.mxu0 %v1396_v0 }
 0x1fd   :  { %856 = vmatprep.mubr.f32.mxu1 %v1396_v0 }
 0x1ff   :  { %1258 = vmatmul.mubr.msk.f32.gmra.mrb[24].mxu0 %vm87_vm0, %v1515_v25 }
 0x200   :  { %1262 = vmatmul.mubr.msk.f32.gmra.mrb[24].mxu1 %vm87_vm0, %v1515_v25  ;;  %943 = vmatprep.mubr.f32.mxu0 %v1396_v0  ;;  %v1654_v25 = vpop.permute.xlu0 %504 }
 0x201   :  { %1026 = vmatprep.mubr.f32.mxu1 %v1396_v0 }
 0x2be   :  { %v580_v19 = vpop.f32.mrb[14].mxu0 }
 0x2bf   :  { %v581_v40 = vadd.f32 %v580_v19, %v1648_v14  ;;  %v657_v22 = vpop.f32.mrb[14].mxu1  ;;  %v582_v42 = vpop.f32.mrb[15].mxu0 }
 0x2c0   :  { %v658_v43 = vadd.f32 %v657_v22, %v1648_v14  ;;  %v583_v44 = vadd.f32 %v582_v42, %v1648_v14  ;;  %v659_v45 = vpop.f32.mrb[15].mxu1 }
 0x2c1   :  { %668 = vst [vmem:[#allocation5] sm:$0xff] %v581_v40  ;;  %v660_v46 = vadd.f32 %v659_v45, %v1648_v14 }
 0x2c2   :  { %670 = vst [vmem:[#allocation5 + $0x10] sm:$0xff] %v658_v43  ;;  %669 = vst [vmem:[#allocation5 + $0x8] sm:$0xff] %v583_v44  ;;  %v586_v47 = vpop.f32.mrb[16].mxu0 }
 0x2c3   :  { %671 = vst [vmem:[#allocation5 + $0x18] sm:$0xff] %v660_v46  ;;  %v587_v48 = vadd.f32 %v586_v47, %v1654_v25  ;;  %v663_v49 = vpop.f32.mrb[16].mxu1  ;;  %v588_v50 = vpop.f32.mrb[17].mxu0 }
 0x2c4   :  { %v664_v51 = vadd.f32 %v663_v49, %v1654_v25  ;;  %v589_v52 = vadd.f32 %v588_v50, %v1654_v25  ;;  %v665_v53 = vpop.f32.mrb[17].mxu1 }
 0x2c5   :  { %672 = vst [vmem:[#allocation5 + $0x40] sm:$0xff] %v587_v48  ;;  %v666_v55 = vadd.f32 %v665_v53, %v1654_v25 }
 0x2c6   :  { %674 = vst [vmem:[#allocation5 + $0x50] sm:$0xff] %v664_v51  ;;  %673 = vst [vmem:[#allocation5 + $0x48] sm:$0xff] %v589_v52  ;;  %v751_v56 = vpop.f32.mrb[18].mxu0 }
 0x2c7   :  { %675 = vst [vmem:[#allocation5 + $0x58] sm:$0xff] %v666_v55  ;;  %v840_v57 = vpop.f32.mrb[18].mxu1  ;;  %v753_v58 = vpop.f32.mrb[19].mxu0  ;;  %v752_v60 = vadd.f32 %v751_v56, %v1527_v27 }
 0x2c8   :  { %v842_v59 = vpop.f32.mrb[19].mxu1  ;;  %v841_v61 = vadd.f32 %v840_v57, %v1527_v27  ;;  %v754_v62 = vadd.f32 %v753_v58, %v1527_v27 }
 0x2c9   :  { %v843_v2 = vadd.f32 %v842_v59, %v1527_v27  ;;  %v863_v9 = vmax.f32 %v752_v60, 0.0 }
 0x2ca   :  { %v757_v1 = vpop.f32.mrb[20].mxu0  ;;  %v865_v12 = vmax.f32 %v841_v61, 0.0  ;;  %v864_v13 = vmax.f32 %v754_v62, 0.0 }
 0x2cb   :  { %v758_v3 = vadd.f32 %v757_v1, %v1530_v33  ;;  %v846_v4 = vpop.f32.mrb[20].mxu1  ;;  %v759_v5 = vpop.f32.mrb[21].mxu0  ;;  %v866_v18 = vmax.f32 %v843_v2, 0.0 }
 0x2cc   :  { %v847_v6 = vadd.f32 %v846_v4, %v1530_v33  ;;  %v760_v7 = vadd.f32 %v759_v5, %v1530_v33  ;;  %v848_v8 = vpop.f32.mrb[21].mxu1 }
 0x2cd   :  { %v867_v10 = vmax.f32 %v758_v3, 0.0  ;;  %v849_v11 = vadd.f32 %v848_v8, %v1530_v33 }
 0x2ce   :  { %v869_v15 = vmax.f32 %v847_v6, 0.0  ;;  %v868_v16 = vmax.f32 %v760_v7, 0.0  ;;  %v763_v17 = vpop.f32.mrb[22].mxu0 }
 0x2cf   :  { %v1315_v27 = vpack.c.bf16 %v867_v10, %v863_v9  ;;  %v870_v20 = vmax.f32 %v849_v11, 0.0  ;;  %v852_v21 = vpop.f32.mrb[22].mxu1  ;;  %v765_v24 = vpop.f32.mrb[23].mxu0  ;;  %v764_v35 = vadd.f32 %v763_v17, %v1536_v41 }
 0x2d0   :  { %v1323_v26 = vpack.c.bf16 %v869_v15, %v865_v12  ;;  %v1313_v28 = vpack.c.bf16 %v868_v16, %v864_v13  ;;  %v854_v32 = vpop.f32.mrb[23].mxu1  ;;  %v853_v37 = vadd.f32 %v852_v21, %v1536_v41  ;;  %v766_v33 = vadd.f32 %v765_v24, %v1536_v41 }
 0x2d1   :  { %v1321_v34 = vpack.c.bf16 %v870_v20, %v866_v18  ;;  %v855_v40 = vadd.f32 %v854_v32, %v1536_v41  ;;  %v871_v47 = vmax.f32 %v764_v35, 0.0 }
 0x2d2   :  { %v769_v19 = vpop.f32.mrb[24].mxu0  ;;  %1314 = vmatprep.subr.bf16.mxu0 %v1313_v28  ;;  %v873_v50 = vmax.f32 %v853_v37, 0.0  ;;  %v872_v51 = vmax.f32 %v766_v33, 0.0 }
 0x2d3   :  { %v770_v22 = vadd.f32 %v769_v19, %v1542_v63  ;;  %v858_v42 = vpop.f32.mrb[24].mxu1  ;;  %1322 = vmatprep.subr.bf16.mxu1 %v1321_v34  ;;  %v771_v43 = vpop.f32.mrb[25].mxu0  ;;  %1316 = vmatpush1.bf16.msra.mxu0 %v1315_v27  ;;  %v874_v53 = vmax.f32 %v855_v40, 0.0 }
 0x2d4   :  { %v859_v44 = vadd.f32 %v858_v42, %v1542_v63  ;;  %v772_v45 = vadd.f32 %v771_v43, %v1542_v63  ;;  %v860_v46 = vpop.f32.mrb[25].mxu1  ;;  %1324 = vmatpush1.bf16.msra.mxu1 %v1323_v26 }
 0x2d5   :  { %v875_v48 = vmax.f32 %v770_v22, 0.0  ;;  %v861_v49 = vadd.f32 %v860_v46, %v1542_v63 }
 0x2d6   :  { %v877_v52 = vmax.f32 %v859_v44, 0.0  ;;  %v876_v41 = vmax.f32 %v772_v45, 0.0 }
 0x2d7   :  { %v1319_v55 = vpack.c.bf16 %v875_v48, %v871_v47  ;;  %v878_v56 = vmax.f32 %v861_v49, 0.0 }
 0x2d8   :  { %v1327_v57 = vpack.c.bf16 %v877_v52, %v873_v50  ;;  %v1317_v58 = vpack.c.bf16 %v876_v41, %v872_v51 }
 0x2d9   :  { %v1325_v59 = vpack.c.bf16 %v878_v56, %v874_v53 }
 0x2da   :  { %1318 = vmatprep.subr.bf16.mxu0 %v1317_v58 }
 0x2db   :  { %1326 = vmatprep.subr.bf16.mxu1 %v1325_v59  ;;  %1320 = vmatpush1.bf16.msra.mxu0 %v1319_v55 }
 0x2dc   :  { %1328 = vmatpush1.bf16.msra.mxu1 %v1327_v57 }
 0x2de   :  { %1263 = vmatmul.mubr.msk.f32.vlgmr.msra.gmra.mrb[26].mxu0 %vm309_vm1, %v1554_v29 }
 0x2df   :  { %1266 = vmatmul.mubr.msk.f32.vlgmr.msra.gmra.mrb[26].mxu1 %vm309_vm1, %v1554_v29  ;;  %949 = vmatprep.mubr.f32.mxu0 %v1396_v0 }
 0x2e0   :  { %1032 = vmatprep.mubr.f32.mxu1 %v1396_v0 }
 0x2e2   :  { %1264 = vmatmul.mubr.msk.f32.gmra.mrb[28].mxu0 %vm309_vm1, %v1564_v30 }
 0x2e3   :  { %1267 = vmatmul.mubr.msk.f32.gmra.mrb[28].mxu1 %vm309_vm1, %v1564_v30  ;;  %955 = vmatprep.mubr.f32.mxu0 %v1396_v0 }
 0x2e4   :  { %1038 = vmatprep.mubr.f32.mxu1 %v1396_v0 }
 0x2e6   :  { %1265 = vmatmul.mubr.msk.f32.gmra.mrb[30].mxu0 %vm309_vm1, %v1575_v31 }
 0x2e7   :  { %1268 = vmatmul.mubr.msk.f32.gmra.mrb[30].mxu1 %vm309_vm1, %v1575_v31  ;;  %1121 = vmatprep.mubr.f32.mxu0 %v1396_v0 }
 0x2e8   :  { %1198 = vmatprep.mubr.f32.mxu1 %v1396_v0 }
 0x3b1   :  { %v945_v63 = vpop.f32.mrb[26].mxu0 }
 0x3b2   :  { %v1028_v29 = vpop.f32.mrb[26].mxu1  ;;  %v947_v60 = vpop.f32.mrb[27].mxu0  ;;  %v946_v30 = vadd.f32 %v945_v63, %v1584_v36 }
 0x3b3   :  { %v1030_v61 = vpop.f32.mrb[27].mxu1  ;;  %v1029_v62 = vadd.f32 %v1028_v29, %v1584_v36  ;;  %v948_v1 = vadd.f32 %v947_v60, %v1584_v36 }
 0x3b4   :  { %v1031_v3 = vadd.f32 %v1030_v61, %v1584_v36  ;;  %v1045_v9 = vmax.f32 %v946_v30, 0.0 }
 0x3b5   :  { %v951_v2 = vpop.f32.mrb[28].mxu0  ;;  %v1047_v12 = vmax.f32 %v1029_v62, 0.0  ;;  %v1046_v13 = vmax.f32 %v948_v1, 0.0 }
 0x3b6   :  { %v952_v4 = vadd.f32 %v951_v2, %v1587_v39  ;;  %v1034_v31 = vpop.f32.mrb[28].mxu1  ;;  %v953_v5 = vpop.f32.mrb[29].mxu0  ;;  %v1048_v18 = vmax.f32 %v1031_v3, 0.0 }
 0x3b7   :  { %v1035_v6 = vadd.f32 %v1034_v31, %v1587_v39  ;;  %v954_v7 = vadd.f32 %v953_v5, %v1587_v39  ;;  %v1036_v8 = vpop.f32.mrb[29].mxu1 }
 0x3b8   :  { %v1049_v10 = vmax.f32 %v952_v4, 0.0  ;;  %v1037_v11 = vadd.f32 %v1036_v8, %v1587_v39 }
 0x3b9   :  { %v1051_v15 = vmax.f32 %v1035_v6, 0.0  ;;  %v1050_v16 = vmax.f32 %v954_v7, 0.0  ;;  %v957_v17 = vpop.f32.mrb[30].mxu0 }
 0x3ba   :  { %v1331_v36 = vpack.c.bf16 %v1049_v10, %v1045_v9  ;;  %v1052_v27 = vmax.f32 %v1037_v11, 0.0  ;;  %v1040_v20 = vpop.f32.mrb[30].mxu1  ;;  %v959_v21 = vpop.f32.mrb[31].mxu0  ;;  %v958_v35 = vadd.f32 %v957_v17, %v1596_v54 }
 0x3bb   :  { %v1335_v24 = vpack.c.bf16 %v1051_v15, %v1047_v12  ;;  %v1329_v26 = vpack.c.bf16 %v1050_v16, %v1046_v13  ;;  %v960_v28 = vadd.f32 %v959_v21, %v1596_v54  ;;  %v1042_v32 = vpop.f32.mrb[31].mxu1  ;;  %v1041_v37 = vadd.f32 %v1040_v20, %v1596_v54 }
 0x3bc   :  { %v1333_v34 = vpack.c.bf16 %v1052_v27, %v1048_v18  ;;  %v1043_v39 = vadd.f32 %v1042_v32, %v1596_v54  ;;  %v1053_v40 = vmax.f32 %v958_v35, 0.0 }
 0x3bd   :  { %v1054_v33 = vmax.f32 %v960_v28, 0.0  ;;  %1330 = vmatprep.subr.bf16.mxu0 %v1329_v26  ;;  %v1055_v22 = vmax.f32 %v1041_v37, 0.0 }
 0x3be   :  { %v1056_v19 = vmax.f32 %v1043_v39, 0.0  ;;  %1334 = vmatprep.subr.bf16.mxu1 %v1333_v34  ;;  %1332 = vmatpush1.bf16.msra.mxu0 %v1331_v36 }
 0x3bf   :  { %1336 = vmatpush1.bf16.msra.mxu1 %v1335_v24  ;;  %1061 = vmatprep.subr.mxu0 %v1054_v33 }
 0x3c0   :  { %1138 = vmatprep.subr.mxu1 %v1056_v19 }
 0x3c2   :  { %1062 = vmatpush1.msra.mxu0 %v1053_v40 }
 0x3c3   :  { %1139 = vmatpush1.msra.mxu1 %v1055_v22  ;;  %1269 = vmatmul.mubr.msk.f32.vlgmr.msra.gmra.mrb[32].mxu0 %vm507_vm2, %v1605_v23 }
 0x3c4   :  { %1271 = vmatmul.mubr.msk.f32.vlgmr.msra.gmra.mrb[32].mxu1 %vm507_vm2, %v1605_v23  ;;  %1127 = vmatprep.mubr.f32.mxu0 %v1396_v0 }
 0x3c5   :  { %1204 = vmatprep.mubr.f32.mxu1 %v1396_v0 }
 0x3c7   :  { %1270 = vmatmul.mubr.msk.f32.gmra.mrb[34].mxu0 %vm507_vm2, %v1615_v38 }
 0x3c8   :  { %1272 = vmatmul.mubr.msk.f32.gmra.mrb[34].mxu1 %vm507_vm2, %v1615_v38 }
 0x496   :  { %v1123_v54 = vpop.f32.mrb[32].mxu0 }
 0x497   :  { %v1124_v42 = vadd.f32 %v1123_v54, %v1648_v14  ;;  %v1200_v43 = vpop.f32.mrb[32].mxu1  ;;  %v1125_v44 = vpop.f32.mrb[33].mxu0 }
 0x498   :  { %v1201_v45 = vadd.f32 %v1200_v43, %v1648_v14  ;;  %v1126_v46 = vadd.f32 %v1125_v44, %v1648_v14  ;;  %v1202_v23 = vpop.f32.mrb[33].mxu1 }
 0x499   :  { %1212 = vst [vmem:[#allocation5 + $0x20] sm:$0xff] %v1124_v42  ;;  %v1203_v47 = vadd.f32 %v1202_v23, %v1648_v14 }
 0x49a   :  { %1214 = vst [vmem:[#allocation5 + $0x30] sm:$0xff] %v1201_v45  ;;  %1213 = vst [vmem:[#allocation5 + $0x28] sm:$0xff] %v1126_v46  ;;  %v1129_v0 = vpop.f32.mrb[34].mxu0 }
 0x49b   :  { %1215 = vst [vmem:[#allocation5 + $0x38] sm:$0xff] %v1203_v47  ;;  %v1130_v38 = vadd.f32 %v1129_v0, %v1654_v25  ;;  %v1206_v48 = vpop.f32.mrb[34].mxu1  ;;  %v1131_v49 = vpop.f32.mrb[35].mxu0 }
 0x49c   :  { %v1207_v50 = vadd.f32 %v1206_v48, %v1654_v25  ;;  %v1132_v51 = vadd.f32 %v1131_v49, %v1654_v25  ;;  %v1208_v52 = vpop.f32.mrb[35].mxu1 }
 0x49d   :  { %1216 = vst [vmem:[#allocation5 + $0x60] sm:$0xff] %v1130_v38  ;;  %v1209_v41 = vadd.f32 %v1208_v52, %v1654_v25 }
 0x49e   :  { %1218 = vst [vmem:[#allocation5 + $0x70] sm:$0xff] %v1207_v50  ;;  %1217 = vst [vmem:[#allocation5 + $0x68] sm:$0xff] %v1132_v51 }
 0x49f   :  { %1219 = vst [vmem:[#allocation5 + $0x78] sm:$0xff] %v1209_v41 }
 0x4a0   :  { %1378 = shalt.err (!%p1375_p12)
}
 0x4a1   :  { %s1379_s27 = scalar_lea.hbm %s1746_s7, 2048 }
 0x4a2   :  { %p1380_p13 = scmp.ne.s32.totalorder %s1746_s7, %s1379_s27  ;;  %p1383_p0 = scmp.lt.u32.totalorder %s1379_s27, %s1746_s7 }
 0x4a4   :  { %p1385_p1 = pnand %p1383_p0, %p1380_p13 }
 0x4a6   :  { %1388 = shalt.err (!%p1385_p1)
}
 0x4a7   :  { %1231 = dma.vmem_to_hbm [thread:$0]  %s1226_s23, 2048, %s1746_s7, [#allocation4], %s1394_s11, %s1394_s11, %s1395_s12  }
 0x4a8   :  { %1391 = dma.done.wait [#allocation4], 2048  }
 0x4a9   :  { %1392 = vsyncadd [#allocation4], 4294965248 }
 0x4aa   :  { %1235 = vsyncpa [#allocation3], 1 }
 0x4ab   :  { %1236 = vsyncpa [#allocation4], 1 }

</bundles_post_ra>
